<compile_context>
chip_gen: v5e
topology: v5e:2x2
jax: 0.10.0
libtpu: 0.0.40
codegen_flags: <defaults>
</compile_context>

<pallas_src>
import math
import jax
import jax.numpy as jnp
from jax.experimental import pallas as pl
from jax.experimental.pallas import tpu as pltpu  # noqa: F401  (TPU backend)

B, L, E = 2, 8, 32
H = 4
DH = E // H
SCALE = 1.0 / math.sqrt(DH)


def _fused_attention_kernel(x_ref, wq_ref, bq_ref, wv_ref, bv_ref,
                            wlm_ref, blm_ref, out_ref):
    # x_ref: (B*L, E); wq/wv/wlm: (E, E); bq/bv/blm: (1, E); out_ref: (B*L, E)
    x = x_ref[...]                                                        # (16, 32)

    # Q / V projections only — K is computed-but-unused in the reference, so it
    # is skipped (1/3 fewer projection FLOPs + weight bytes, zero numeric change).
    q = jnp.dot(x, wq_ref[...], preferred_element_type=jnp.float32) + bq_ref[...]
    v = jnp.dot(x, wv_ref[...], preferred_element_type=jnp.float32) + bv_ref[...]
    q = q * SCALE                                   # fold 1/sqrt(d_head) in once

    rows_per_head = (L * DH) // E                   # 2  flat output rows per (b, h)
    seq_per_row = E // DH                           # 4  seq positions packed per row

    # Static per-(batch, head) loop with 2-D dots / slices / concats only — all
    # ops are known-safe Mosaic lowerings (no generic reshape of minor dims).
    rows = []                                       # B*L pieces of shape (1, E)
    for b in range(B):
        qb = q[b * L:(b + 1) * L, :]                # (L, E)  sublane slice
        vb = v[b * L:(b + 1) * L, :]
        for h in range(H):
            qh = qb[:, h * DH:(h + 1) * DH]         # (L, DH) lane slice
            vh = vb[:, h * DH:(h + 1) * DH]
            # reference bug reproduced: scores use V (not K)
            s = jnp.dot(qh, vh.T, preferred_element_type=jnp.float32)    # (L, L)
            s = s - jnp.max(s, axis=-1, keepdims=True)
            p = jnp.exp(s)
            p = p * pl.reciprocal(jnp.sum(p, axis=-1, keepdims=True), approx=True)
            oh = jnp.dot(p, vh, preferred_element_type=jnp.float32)      # (L, DH)
            # Buggy (B,H,L,DH) -> (B,L,E) row-major reshape: each flat output row
            # packs `seq_per_row` consecutive seq positions of this head laterally.
            for t in range(rows_per_head):
                base = t * seq_per_row
                rows.append(jnp.concatenate(
                    [oh[base + j: base + j + 1, :] for j in range(seq_per_row)],
                    axis=1))                                             # (1, E)

    o2 = jnp.concatenate(rows, axis=0)                                   # (B*L, E)

    # Fused lm_head on the lane-dense slab.
    y = jnp.dot(o2, wlm_ref[...], preferred_element_type=jnp.float32) + blm_ref[...]
    out_ref[...] = y.astype(out_ref.dtype)


def self_attention_forward(x, wqkv, bqkv, wlm, blm):
    Bv, Lv, Ev = x.shape
    x2 = x.reshape(Bv * Lv, Ev)                     # free metadata reshape in JAX
    # Pre-slice Q / V columns of the qkv projection (K is never used).
    wq = wqkv[:, 0:Ev]
    wv = wqkv[:, 2 * Ev:3 * Ev]
    bq = bqkv[0:Ev].reshape(1, Ev)
    bv = bqkv[2 * Ev:3 * Ev].reshape(1, Ev)

    # Single fused pallas_call, no grid: everything fits in a couple of vregs,
    # whole arrays are mapped straight into VMEM.
    y2 = pl.pallas_call(
        _fused_attention_kernel,
        out_shape=jax.ShapeDtypeStruct((Bv * Lv, Ev), jnp.float32),
    )(x2, wq, bq, wv, bv, wlm, blm.reshape(1, Ev))

    return y2.reshape(Bv, Lv, Ev)


def _reference(x, wqkv, bqkv, wlm, blm):
    """Pure-JAX mirror of the PyTorch forward (mask=False), bugs included."""
    qkv = x @ wqkv + bqkv
    q, _k, v = jnp.split(qkv, 3, axis=-1)
    q = q.reshape(B, L, H, DH).transpose(0, 2, 1, 3)
    v = v.reshape(B, L, H, DH).transpose(0, 2, 1, 3)
    s = jnp.einsum('bhld,bhmd->bhlm', q, v) * SCALE          # q @ v^T (as in ref)
    p = jax.nn.softmax(s, axis=-1)
    o = jnp.einsum('bhlm,bhmd->bhld', p, v)                  # (B, H, L, DH)
    o = o.reshape(B, L, E)                                   # buggy reshape reproduced
    return o @ wlm + blm


if __name__ == "__main__":
    key = jax.random.PRNGKey(0)
    k1, k2, k3, k4, k5 = jax.random.split(key, 5)
    x = jax.random.normal(k1, (B, L, E), jnp.float32)
    # Deterministic synthetic parameters (torch.nn.Linear shapes, stored as (in, out)).
    wqkv = jax.random.normal(k2, (E, 3 * E), jnp.float32) * 0.02
    bqkv = jax.random.normal(k3, (3 * E,), jnp.float32) * 0.02
    wlm = jax.random.normal(k4, (E, E), jnp.float32) * 0.02
    blm = jax.random.normal(k5, (E,), jnp.float32) * 0.02

    out = self_attention_forward(x, wqkv, bqkv, wlm, blm)
    jax.block_until_ready(out)

    ref = _reference(x, wqkv, bqkv, wlm, blm)
    assert out.shape == (B, L, E)
    assert jnp.allclose(out, ref, atol=1e-4, rtol=1e-4), "kernel output != reference"
    print("KERNEL_OK")
</pallas_src>

<mosaic_0001>
module attributes {stable_mosaic.version = 11 : i64} {
  func.func @_fused_attention_kernel(%arg0: memref<16x32xf32, #tpu.memory_space<vmem>>, %arg1: memref<32x32xf32, #tpu.memory_space<vmem>>, %arg2: memref<1x32xf32, #tpu.memory_space<vmem>>, %arg3: memref<32x32xf32, #tpu.memory_space<vmem>>, %arg4: memref<1x32xf32, #tpu.memory_space<vmem>>, %arg5: memref<32x32xf32, #tpu.memory_space<vmem>>, %arg6: memref<1x32xf32, #tpu.memory_space<vmem>>, %arg7: memref<16x32xf32, #tpu.memory_space<vmem>>) attributes {dimension_semantics = [], scalar_prefetch = 0 : i64, scratch_operands = 0 : i64, tpu.core_type = #tpu.core_type<tc>} {
    %c0 = arith.constant 0 : index
    %c0_0 = arith.constant 0 : index
    %0 = vector.load %arg0[%c0, %c0_0] : memref<16x32xf32, #tpu.memory_space<vmem>>, vector<16x32xf32>
    %c0_1 = arith.constant 0 : index
    %c0_2 = arith.constant 0 : index
    %1 = vector.load %arg1[%c0_1, %c0_2] : memref<32x32xf32, #tpu.memory_space<vmem>>, vector<32x32xf32>
    %cst = arith.constant dense<0.000000e+00> : vector<16x32xf32>
    %2 = tpu.matmul %0, %1, %cst {dimension_numbers = #tpu.dot_dimension_numbers<[1], [0], [0], [1], [0, 0, 1, 1], [], []>} : vector<16x32xf32>, vector<32x32xf32>, vector<16x32xf32> -> vector<16x32xf32>
    %c0_3 = arith.constant 0 : index
    %c0_4 = arith.constant 0 : index
    %3 = vector.load %arg2[%c0_3, %c0_4] : memref<1x32xf32, #tpu.memory_space<vmem>>, vector<1x32xf32>
    %4 = vector.broadcast %3 : vector<1x32xf32> to vector<16x32xf32>
    %5 = arith.addf %2, %4 : vector<16x32xf32>
    %c0_5 = arith.constant 0 : index
    %c0_6 = arith.constant 0 : index
    %6 = vector.load %arg3[%c0_5, %c0_6] : memref<32x32xf32, #tpu.memory_space<vmem>>, vector<32x32xf32>
    %cst_7 = arith.constant dense<0.000000e+00> : vector<16x32xf32>
    %7 = tpu.matmul %0, %6, %cst_7 {dimension_numbers = #tpu.dot_dimension_numbers<[1], [0], [0], [1], [0, 0, 1, 1], [], []>} : vector<16x32xf32>, vector<32x32xf32>, vector<16x32xf32> -> vector<16x32xf32>
    %c0_8 = arith.constant 0 : index
    %c0_9 = arith.constant 0 : index
    %8 = vector.load %arg4[%c0_8, %c0_9] : memref<1x32xf32, #tpu.memory_space<vmem>>, vector<1x32xf32>
    %9 = vector.broadcast %8 : vector<1x32xf32> to vector<16x32xf32>
    %10 = arith.addf %7, %9 : vector<16x32xf32>
    %cst_10 = arith.constant 0.353553385 : f32
    %11 = vector.broadcast %cst_10 : f32 to vector<16x32xf32>
    %12 = arith.mulf %5, %11 : vector<16x32xf32>
    %13 = vector.extract_strided_slice %12 {offsets = [0, 0], sizes = [8, 32], strides = [1, 1]} : vector<16x32xf32> to vector<8x32xf32>
    %14 = vector.extract_strided_slice %10 {offsets = [0, 0], sizes = [8, 32], strides = [1, 1]} : vector<16x32xf32> to vector<8x32xf32>
    %15 = vector.extract_strided_slice %13 {offsets = [0, 0], sizes = [8, 8], strides = [1, 1]} : vector<8x32xf32> to vector<8x8xf32>
    %16 = vector.extract_strided_slice %14 {offsets = [0, 0], sizes = [8, 8], strides = [1, 1]} : vector<8x32xf32> to vector<8x8xf32>
    %17 = tpu.transpose %16, [1, 0] : vector<8x8xf32> -> vector<8x8xf32>
    %cst_11 = arith.constant dense<0.000000e+00> : vector<8x8xf32>
    %18 = tpu.matmul %15, %17, %cst_11 {dimension_numbers = #tpu.dot_dimension_numbers<[1], [0], [0], [1], [0, 0, 1, 1], [], []>} : vector<8x8xf32>, vector<8x8xf32>, vector<8x8xf32> -> vector<8x8xf32>
    %cst_12 = arith.constant dense<0xFF800000> : vector<8xf32>
    %19 = vector.multi_reduction <maximumf>, %18, %cst_12 [1] : vector<8x8xf32> to vector<8xf32>
    %20 = vector.shape_cast %19 : vector<8xf32> to vector<8x1xf32>
    %21 = vector.broadcast %20 : vector<8x1xf32> to vector<8x8xf32>
    %22 = arith.subf %18, %21 : vector<8x8xf32>
    %23 = math.exp %22 : vector<8x8xf32>
    %cst_13 = arith.constant dense<0.000000e+00> : vector<8xf32>
    %24 = vector.multi_reduction <add>, %23, %cst_13 [1] : vector<8x8xf32> to vector<8xf32>
    %25 = vector.shape_cast %24 : vector<8xf32> to vector<8x1xf32>
    %26 = tpu.reciprocal %25 {approx = true} : vector<8x1xf32> -> vector<8x1xf32>
    %27 = vector.broadcast %26 : vector<8x1xf32> to vector<8x8xf32>
    %28 = arith.mulf %23, %27 : vector<8x8xf32>
    %cst_14 = arith.constant dense<0.000000e+00> : vector<8x8xf32>
    %29 = tpu.matmul %28, %16, %cst_14 {dimension_numbers = #tpu.dot_dimension_numbers<[1], [0], [0], [1], [0, 0, 1, 1], [], []>} : vector<8x8xf32>, vector<8x8xf32>, vector<8x8xf32> -> vector<8x8xf32>
    %30 = vector.extract_strided_slice %29 {offsets = [0, 0], sizes = [1, 8], strides = [1, 1]} : vector<8x8xf32> to vector<1x8xf32>
    %31 = vector.extract_strided_slice %29 {offsets = [1, 0], sizes = [1, 8], strides = [1, 1]} : vector<8x8xf32> to vector<1x8xf32>
    %32 = vector.extract_strided_slice %29 {offsets = [2, 0], sizes = [1, 8], strides = [1, 1]} : vector<8x8xf32> to vector<1x8xf32>
    %33 = vector.extract_strided_slice %29 {offsets = [3, 0], sizes = [1, 8], strides = [1, 1]} : vector<8x8xf32> to vector<1x8xf32>
    %34 = tpu.concatenate %30, %31, %32, %33 in 1 : vector<1x8xf32>, vector<1x8xf32>, vector<1x8xf32>, vector<1x8xf32> -> vector<1x32xf32>
    %35 = vector.extract_strided_slice %29 {offsets = [4, 0], sizes = [1, 8], strides = [1, 1]} : vector<8x8xf32> to vector<1x8xf32>
    %36 = vector.extract_strided_slice %29 {offsets = [5, 0], sizes = [1, 8], strides = [1, 1]} : vector<8x8xf32> to vector<1x8xf32>
    %37 = vector.extract_strided_slice %29 {offsets = [6, 0], sizes = [1, 8], strides = [1, 1]} : vector<8x8xf32> to vector<1x8xf32>
    %38 = vector.extract_strided_slice %29 {offsets = [7, 0], sizes = [1, 8], strides = [1, 1]} : vector<8x8xf32> to vector<1x8xf32>
    %39 = tpu.concatenate %35, %36, %37, %38 in 1 : vector<1x8xf32>, vector<1x8xf32>, vector<1x8xf32>, vector<1x8xf32> -> vector<1x32xf32>
    %40 = vector.extract_strided_slice %13 {offsets = [0, 8], sizes = [8, 8], strides = [1, 1]} : vector<8x32xf32> to vector<8x8xf32>
    %41 = vector.extract_strided_slice %14 {offsets = [0, 8], sizes = [8, 8], strides = [1, 1]} : vector<8x32xf32> to vector<8x8xf32>
    %42 = tpu.transpose %41, [1, 0] : vector<8x8xf32> -> vector<8x8xf32>
    %cst_15 = arith.constant dense<0.000000e+00> : vector<8x8xf32>
    %43 = tpu.matmul %40, %42, %cst_15 {dimension_numbers = #tpu.dot_dimension_numbers<[1], [0], [0], [1], [0, 0, 1, 1], [], []>} : vector<8x8xf32>, vector<8x8xf32>, vector<8x8xf32> -> vector<8x8xf32>
    %cst_16 = arith.constant dense<0xFF800000> : vector<8xf32>
    %44 = vector.multi_reduction <maximumf>, %43, %cst_16 [1] : vector<8x8xf32> to vector<8xf32>
    %45 = vector.shape_cast %44 : vector<8xf32> to vector<8x1xf32>
    %46 = vector.broadcast %45 : vector<8x1xf32> to vector<8x8xf32>
    %47 = arith.subf %43, %46 : vector<8x8xf32>
    %48 = math.exp %47 : vector<8x8xf32>
    %cst_17 = arith.constant dense<0.000000e+00> : vector<8xf32>
    %49 = vector.multi_reduction <add>, %48, %cst_17 [1] : vector<8x8xf32> to vector<8xf32>
    %50 = vector.shape_cast %49 : vector<8xf32> to vector<8x1xf32>
    %51 = tpu.reciprocal %50 {approx = true} : vector<8x1xf32> -> vector<8x1xf32>
    %52 = vector.broadcast %51 : vector<8x1xf32> to vector<8x8xf32>
    %53 = arith.mulf %48, %52 : vector<8x8xf32>
    %cst_18 = arith.constant dense<0.000000e+00> : vector<8x8xf32>
    %54 = tpu.matmul %53, %41, %cst_18 {dimension_numbers = #tpu.dot_dimension_numbers<[1], [0], [0], [1], [0, 0, 1, 1], [], []>} : vector<8x8xf32>, vector<8x8xf32>, vector<8x8xf32> -> vector<8x8xf32>
    %55 = vector.extract_strided_slice %54 {offsets = [0, 0], sizes = [1, 8], strides = [1, 1]} : vector<8x8xf32> to vector<1x8xf32>
    %56 = vector.extract_strided_slice %54 {offsets = [1, 0], sizes = [1, 8], strides = [1, 1]} : vector<8x8xf32> to vector<1x8xf32>
    %57 = vector.extract_strided_slice %54 {offsets = [2, 0], sizes = [1, 8], strides = [1, 1]} : vector<8x8xf32> to vector<1x8xf32>
    %58 = vector.extract_strided_slice %54 {offsets = [3, 0], sizes = [1, 8], strides = [1, 1]} : vector<8x8xf32> to vector<1x8xf32>
    %59 = tpu.concatenate %55, %56, %57, %58 in 1 : vector<1x8xf32>, vector<1x8xf32>, vector<1x8xf32>, vector<1x8xf32> -> vector<1x32xf32>
    %60 = vector.extract_strided_slice %54 {offsets = [4, 0], sizes = [1, 8], strides = [1, 1]} : vector<8x8xf32> to vector<1x8xf32>
    %61 = vector.extract_strided_slice %54 {offsets = [5, 0], sizes = [1, 8], strides = [1, 1]} : vector<8x8xf32> to vector<1x8xf32>
    %62 = vector.extract_strided_slice %54 {offsets = [6, 0], sizes = [1, 8], strides = [1, 1]} : vector<8x8xf32> to vector<1x8xf32>
    %63 = vector.extract_strided_slice %54 {offsets = [7, 0], sizes = [1, 8], strides = [1, 1]} : vector<8x8xf32> to vector<1x8xf32>
    %64 = tpu.concatenate %60, %61, %62, %63 in 1 : vector<1x8xf32>, vector<1x8xf32>, vector<1x8xf32>, vector<1x8xf32> -> vector<1x32xf32>
    %65 = vector.extract_strided_slice %13 {offsets = [0, 16], sizes = [8, 8], strides = [1, 1]} : vector<8x32xf32> to vector<8x8xf32>
    %66 = vector.extract_strided_slice %14 {offsets = [0, 16], sizes = [8, 8], strides = [1, 1]} : vector<8x32xf32> to vector<8x8xf32>
    %67 = tpu.transpose %66, [1, 0] : vector<8x8xf32> -> vector<8x8xf32>
    %cst_19 = arith.constant dense<0.000000e+00> : vector<8x8xf32>
    %68 = tpu.matmul %65, %67, %cst_19 {dimension_numbers = #tpu.dot_dimension_numbers<[1], [0], [0], [1], [0, 0, 1, 1], [], []>} : vector<8x8xf32>, vector<8x8xf32>, vector<8x8xf32> -> vector<8x8xf32>
    %cst_20 = arith.constant dense<0xFF800000> : vector<8xf32>
    %69 = vector.multi_reduction <maximumf>, %68, %cst_20 [1] : vector<8x8xf32> to vector<8xf32>
    %70 = vector.shape_cast %69 : vector<8xf32> to vector<8x1xf32>
    %71 = vector.broadcast %70 : vector<8x1xf32> to vector<8x8xf32>
    %72 = arith.subf %68, %71 : vector<8x8xf32>
    %73 = math.exp %72 : vector<8x8xf32>
    %cst_21 = arith.constant dense<0.000000e+00> : vector<8xf32>
    %74 = vector.multi_reduction <add>, %73, %cst_21 [1] : vector<8x8xf32> to vector<8xf32>
    %75 = vector.shape_cast %74 : vector<8xf32> to vector<8x1xf32>
    %76 = tpu.reciprocal %75 {approx = true} : vector<8x1xf32> -> vector<8x1xf32>
    %77 = vector.broadcast %76 : vector<8x1xf32> to vector<8x8xf32>
    %78 = arith.mulf %73, %77 : vector<8x8xf32>
    %cst_22 = arith.constant dense<0.000000e+00> : vector<8x8xf32>
    %79 = tpu.matmul %78, %66, %cst_22 {dimension_numbers = #tpu.dot_dimension_numbers<[1], [0], [0], [1], [0, 0, 1, 1], [], []>} : vector<8x8xf32>, vector<8x8xf32>, vector<8x8xf32> -> vector<8x8xf32>
    %80 = vector.extract_strided_slice %79 {offsets = [0, 0], sizes = [1, 8], strides = [1, 1]} : vector<8x8xf32> to vector<1x8xf32>
    %81 = vector.extract_strided_slice %79 {offsets = [1, 0], sizes = [1, 8], strides = [1, 1]} : vector<8x8xf32> to vector<1x8xf32>
    %82 = vector.extract_strided_slice %79 {offsets = [2, 0], sizes = [1, 8], strides = [1, 1]} : vector<8x8xf32> to vector<1x8xf32>
    %83 = vector.extract_strided_slice %79 {offsets = [3, 0], sizes = [1, 8], strides = [1, 1]} : vector<8x8xf32> to vector<1x8xf32>
    %84 = tpu.concatenate %80, %81, %82, %83 in 1 : vector<1x8xf32>, vector<1x8xf32>, vector<1x8xf32>, vector<1x8xf32> -> vector<1x32xf32>
    %85 = vector.extract_strided_slice %79 {offsets = [4, 0], sizes = [1, 8], strides = [1, 1]} : vector<8x8xf32> to vector<1x8xf32>
    %86 = vector.extract_strided_slice %79 {offsets = [5, 0], sizes = [1, 8], strides = [1, 1]} : vector<8x8xf32> to vector<1x8xf32>
    %87 = vector.extract_strided_slice %79 {offsets = [6, 0], sizes = [1, 8], strides = [1, 1]} : vector<8x8xf32> to vector<1x8xf32>
    %88 = vector.extract_strided_slice %79 {offsets = [7, 0], sizes = [1, 8], strides = [1, 1]} : vector<8x8xf32> to vector<1x8xf32>
    %89 = tpu.concatenate %85, %86, %87, %88 in 1 : vector<1x8xf32>, vector<1x8xf32>, vector<1x8xf32>, vector<1x8xf32> -> vector<1x32xf32>
    %90 = vector.extract_strided_slice %13 {offsets = [0, 24], sizes = [8, 8], strides = [1, 1]} : vector<8x32xf32> to vector<8x8xf32>
    %91 = vector.extract_strided_slice %14 {offsets = [0, 24], sizes = [8, 8], strides = [1, 1]} : vector<8x32xf32> to vector<8x8xf32>
    %92 = tpu.transpose %91, [1, 0] : vector<8x8xf32> -> vector<8x8xf32>
    %cst_23 = arith.constant dense<0.000000e+00> : vector<8x8xf32>
    %93 = tpu.matmul %90, %92, %cst_23 {dimension_numbers = #tpu.dot_dimension_numbers<[1], [0], [0], [1], [0, 0, 1, 1], [], []>} : vector<8x8xf32>, vector<8x8xf32>, vector<8x8xf32> -> vector<8x8xf32>
    %cst_24 = arith.constant dense<0xFF800000> : vector<8xf32>
    %94 = vector.multi_reduction <maximumf>, %93, %cst_24 [1] : vector<8x8xf32> to vector<8xf32>
    %95 = vector.shape_cast %94 : vector<8xf32> to vector<8x1xf32>
    %96 = vector.broadcast %95 : vector<8x1xf32> to vector<8x8xf32>
    %97 = arith.subf %93, %96 : vector<8x8xf32>
    %98 = math.exp %97 : vector<8x8xf32>
    %cst_25 = arith.constant dense<0.000000e+00> : vector<8xf32>
    %99 = vector.multi_reduction <add>, %98, %cst_25 [1] : vector<8x8xf32> to vector<8xf32>
    %100 = vector.shape_cast %99 : vector<8xf32> to vector<8x1xf32>
    %101 = tpu.reciprocal %100 {approx = true} : vector<8x1xf32> -> vector<8x1xf32>
    %102 = vector.broadcast %101 : vector<8x1xf32> to vector<8x8xf32>
    %103 = arith.mulf %98, %102 : vector<8x8xf32>
    %cst_26 = arith.constant dense<0.000000e+00> : vector<8x8xf32>
    %104 = tpu.matmul %103, %91, %cst_26 {dimension_numbers = #tpu.dot_dimension_numbers<[1], [0], [0], [1], [0, 0, 1, 1], [], []>} : vector<8x8xf32>, vector<8x8xf32>, vector<8x8xf32> -> vector<8x8xf32>
    %105 = vector.extract_strided_slice %104 {offsets = [0, 0], sizes = [1, 8], strides = [1, 1]} : vector<8x8xf32> to vector<1x8xf32>
    %106 = vector.extract_strided_slice %104 {offsets = [1, 0], sizes = [1, 8], strides = [1, 1]} : vector<8x8xf32> to vector<1x8xf32>
    %107 = vector.extract_strided_slice %104 {offsets = [2, 0], sizes = [1, 8], strides = [1, 1]} : vector<8x8xf32> to vector<1x8xf32>
    %108 = vector.extract_strided_slice %104 {offsets = [3, 0], sizes = [1, 8], strides = [1, 1]} : vector<8x8xf32> to vector<1x8xf32>
    %109 = tpu.concatenate %105, %106, %107, %108 in 1 : vector<1x8xf32>, vector<1x8xf32>, vector<1x8xf32>, vector<1x8xf32> -> vector<1x32xf32>
    %110 = vector.extract_strided_slice %104 {offsets = [4, 0], sizes = [1, 8], strides = [1, 1]} : vector<8x8xf32> to vector<1x8xf32>
    %111 = vector.extract_strided_slice %104 {offsets = [5, 0], sizes = [1, 8], strides = [1, 1]} : vector<8x8xf32> to vector<1x8xf32>
    %112 = vector.extract_strided_slice %104 {offsets = [6, 0], sizes = [1, 8], strides = [1, 1]} : vector<8x8xf32> to vector<1x8xf32>
    %113 = vector.extract_strided_slice %104 {offsets = [7, 0], sizes = [1, 8], strides = [1, 1]} : vector<8x8xf32> to vector<1x8xf32>
    %114 = tpu.concatenate %110, %111, %112, %113 in 1 : vector<1x8xf32>, vector<1x8xf32>, vector<1x8xf32>, vector<1x8xf32> -> vector<1x32xf32>
    %115 = vector.extract_strided_slice %12 {offsets = [8, 0], sizes = [8, 32], strides = [1, 1]} : vector<16x32xf32> to vector<8x32xf32>
    %116 = vector.extract_strided_slice %10 {offsets = [8, 0], sizes = [8, 32], strides = [1, 1]} : vector<16x32xf32> to vector<8x32xf32>
    %117 = vector.extract_strided_slice %115 {offsets = [0, 0], sizes = [8, 8], strides = [1, 1]} : vector<8x32xf32> to vector<8x8xf32>
    %118 = vector.extract_strided_slice %116 {offsets = [0, 0], sizes = [8, 8], strides = [1, 1]} : vector<8x32xf32> to vector<8x8xf32>
    %119 = tpu.transpose %118, [1, 0] : vector<8x8xf32> -> vector<8x8xf32>
    %cst_27 = arith.constant dense<0.000000e+00> : vector<8x8xf32>
    %120 = tpu.matmul %117, %119, %cst_27 {dimension_numbers = #tpu.dot_dimension_numbers<[1], [0], [0], [1], [0, 0, 1, 1], [], []>} : vector<8x8xf32>, vector<8x8xf32>, vector<8x8xf32> -> vector<8x8xf32>
    %cst_28 = arith.constant dense<0xFF800000> : vector<8xf32>
    %121 = vector.multi_reduction <maximumf>, %120, %cst_28 [1] : vector<8x8xf32> to vector<8xf32>
    %122 = vector.shape_cast %121 : vector<8xf32> to vector<8x1xf32>
    %123 = vector.broadcast %122 : vector<8x1xf32> to vector<8x8xf32>
    %124 = arith.subf %120, %123 : vector<8x8xf32>
    %125 = math.exp %124 : vector<8x8xf32>
    %cst_29 = arith.constant dense<0.000000e+00> : vector<8xf32>
    %126 = vector.multi_reduction <add>, %125, %cst_29 [1] : vector<8x8xf32> to vector<8xf32>
    %127 = vector.shape_cast %126 : vector<8xf32> to vector<8x1xf32>
    %128 = tpu.reciprocal %127 {approx = true} : vector<8x1xf32> -> vector<8x1xf32>
    %129 = vector.broadcast %128 : vector<8x1xf32> to vector<8x8xf32>
    %130 = arith.mulf %125, %129 : vector<8x8xf32>
    %cst_30 = arith.constant dense<0.000000e+00> : vector<8x8xf32>
    %131 = tpu.matmul %130, %118, %cst_30 {dimension_numbers = #tpu.dot_dimension_numbers<[1], [0], [0], [1], [0, 0, 1, 1], [], []>} : vector<8x8xf32>, vector<8x8xf32>, vector<8x8xf32> -> vector<8x8xf32>
    %132 = vector.extract_strided_slice %131 {offsets = [0, 0], sizes = [1, 8], strides = [1, 1]} : vector<8x8xf32> to vector<1x8xf32>
    %133 = vector.extract_strided_slice %131 {offsets = [1, 0], sizes = [1, 8], strides = [1, 1]} : vector<8x8xf32> to vector<1x8xf32>
    %134 = vector.extract_strided_slice %131 {offsets = [2, 0], sizes = [1, 8], strides = [1, 1]} : vector<8x8xf32> to vector<1x8xf32>
    %135 = vector.extract_strided_slice %131 {offsets = [3, 0], sizes = [1, 8], strides = [1, 1]} : vector<8x8xf32> to vector<1x8xf32>
    %136 = tpu.concatenate %132, %133, %134, %135 in 1 : vector<1x8xf32>, vector<1x8xf32>, vector<1x8xf32>, vector<1x8xf32> -> vector<1x32xf32>
    %137 = vector.extract_strided_slice %131 {offsets = [4, 0], sizes = [1, 8], strides = [1, 1]} : vector<8x8xf32> to vector<1x8xf32>
    %138 = vector.extract_strided_slice %131 {offsets = [5, 0], sizes = [1, 8], strides = [1, 1]} : vector<8x8xf32> to vector<1x8xf32>
    %139 = vector.extract_strided_slice %131 {offsets = [6, 0], sizes = [1, 8], strides = [1, 1]} : vector<8x8xf32> to vector<1x8xf32>
    %140 = vector.extract_strided_slice %131 {offsets = [7, 0], sizes = [1, 8], strides = [1, 1]} : vector<8x8xf32> to vector<1x8xf32>
    %141 = tpu.concatenate %137, %138, %139, %140 in 1 : vector<1x8xf32>, vector<1x8xf32>, vector<1x8xf32>, vector<1x8xf32> -> vector<1x32xf32>
    %142 = vector.extract_strided_slice %115 {offsets = [0, 8], sizes = [8, 8], strides = [1, 1]} : vector<8x32xf32> to vector<8x8xf32>
    %143 = vector.extract_strided_slice %116 {offsets = [0, 8], sizes = [8, 8], strides = [1, 1]} : vector<8x32xf32> to vector<8x8xf32>
    %144 = tpu.transpose %143, [1, 0] : vector<8x8xf32> -> vector<8x8xf32>
    %cst_31 = arith.constant dense<0.000000e+00> : vector<8x8xf32>
    %145 = tpu.matmul %142, %144, %cst_31 {dimension_numbers = #tpu.dot_dimension_numbers<[1], [0], [0], [1], [0, 0, 1, 1], [], []>} : vector<8x8xf32>, vector<8x8xf32>, vector<8x8xf32> -> vector<8x8xf32>
    %cst_32 = arith.constant dense<0xFF800000> : vector<8xf32>
    %146 = vector.multi_reduction <maximumf>, %145, %cst_32 [1] : vector<8x8xf32> to vector<8xf32>
    %147 = vector.shape_cast %146 : vector<8xf32> to vector<8x1xf32>
    %148 = vector.broadcast %147 : vector<8x1xf32> to vector<8x8xf32>
    %149 = arith.subf %145, %148 : vector<8x8xf32>
    %150 = math.exp %149 : vector<8x8xf32>
    %cst_33 = arith.constant dense<0.000000e+00> : vector<8xf32>
    %151 = vector.multi_reduction <add>, %150, %cst_33 [1] : vector<8x8xf32> to vector<8xf32>
    %152 = vector.shape_cast %151 : vector<8xf32> to vector<8x1xf32>
    %153 = tpu.reciprocal %152 {approx = true} : vector<8x1xf32> -> vector<8x1xf32>
    %154 = vector.broadcast %153 : vector<8x1xf32> to vector<8x8xf32>
    %155 = arith.mulf %150, %154 : vector<8x8xf32>
    %cst_34 = arith.constant dense<0.000000e+00> : vector<8x8xf32>
    %156 = tpu.matmul %155, %143, %cst_34 {dimension_numbers = #tpu.dot_dimension_numbers<[1], [0], [0], [1], [0, 0, 1, 1], [], []>} : vector<8x8xf32>, vector<8x8xf32>, vector<8x8xf32> -> vector<8x8xf32>
    %157 = vector.extract_strided_slice %156 {offsets = [0, 0], sizes = [1, 8], strides = [1, 1]} : vector<8x8xf32> to vector<1x8xf32>
    %158 = vector.extract_strided_slice %156 {offsets = [1, 0], sizes = [1, 8], strides = [1, 1]} : vector<8x8xf32> to vector<1x8xf32>
    %159 = vector.extract_strided_slice %156 {offsets = [2, 0], sizes = [1, 8], strides = [1, 1]} : vector<8x8xf32> to vector<1x8xf32>
    %160 = vector.extract_strided_slice %156 {offsets = [3, 0], sizes = [1, 8], strides = [1, 1]} : vector<8x8xf32> to vector<1x8xf32>
    %161 = tpu.concatenate %157, %158, %159, %160 in 1 : vector<1x8xf32>, vector<1x8xf32>, vector<1x8xf32>, vector<1x8xf32> -> vector<1x32xf32>
    %162 = vector.extract_strided_slice %156 {offsets = [4, 0], sizes = [1, 8], strides = [1, 1]} : vector<8x8xf32> to vector<1x8xf32>
    %163 = vector.extract_strided_slice %156 {offsets = [5, 0], sizes = [1, 8], strides = [1, 1]} : vector<8x8xf32> to vector<1x8xf32>
    %164 = vector.extract_strided_slice %156 {offsets = [6, 0], sizes = [1, 8], strides = [1, 1]} : vector<8x8xf32> to vector<1x8xf32>
    %165 = vector.extract_strided_slice %156 {offsets = [7, 0], sizes = [1, 8], strides = [1, 1]} : vector<8x8xf32> to vector<1x8xf32>
    %166 = tpu.concatenate %162, %163, %164, %165 in 1 : vector<1x8xf32>, vector<1x8xf32>, vector<1x8xf32>, vector<1x8xf32> -> vector<1x32xf32>
    %167 = vector.extract_strided_slice %115 {offsets = [0, 16], sizes = [8, 8], strides = [1, 1]} : vector<8x32xf32> to vector<8x8xf32>
    %168 = vector.extract_strided_slice %116 {offsets = [0, 16], sizes = [8, 8], strides = [1, 1]} : vector<8x32xf32> to vector<8x8xf32>
    %169 = tpu.transpose %168, [1, 0] : vector<8x8xf32> -> vector<8x8xf32>
    %cst_35 = arith.constant dense<0.000000e+00> : vector<8x8xf32>
    %170 = tpu.matmul %167, %169, %cst_35 {dimension_numbers = #tpu.dot_dimension_numbers<[1], [0], [0], [1], [0, 0, 1, 1], [], []>} : vector<8x8xf32>, vector<8x8xf32>, vector<8x8xf32> -> vector<8x8xf32>
    %cst_36 = arith.constant dense<0xFF800000> : vector<8xf32>
    %171 = vector.multi_reduction <maximumf>, %170, %cst_36 [1] : vector<8x8xf32> to vector<8xf32>
    %172 = vector.shape_cast %171 : vector<8xf32> to vector<8x1xf32>
    %173 = vector.broadcast %172 : vector<8x1xf32> to vector<8x8xf32>
    %174 = arith.subf %170, %173 : vector<8x8xf32>
    %175 = math.exp %174 : vector<8x8xf32>
    %cst_37 = arith.constant dense<0.000000e+00> : vector<8xf32>
    %176 = vector.multi_reduction <add>, %175, %cst_37 [1] : vector<8x8xf32> to vector<8xf32>
    %177 = vector.shape_cast %176 : vector<8xf32> to vector<8x1xf32>
    %178 = tpu.reciprocal %177 {approx = true} : vector<8x1xf32> -> vector<8x1xf32>
    %179 = vector.broadcast %178 : vector<8x1xf32> to vector<8x8xf32>
    %180 = arith.mulf %175, %179 : vector<8x8xf32>
    %cst_38 = arith.constant dense<0.000000e+00> : vector<8x8xf32>
    %181 = tpu.matmul %180, %168, %cst_38 {dimension_numbers = #tpu.dot_dimension_numbers<[1], [0], [0], [1], [0, 0, 1, 1], [], []>} : vector<8x8xf32>, vector<8x8xf32>, vector<8x8xf32> -> vector<8x8xf32>
    %182 = vector.extract_strided_slice %181 {offsets = [0, 0], sizes = [1, 8], strides = [1, 1]} : vector<8x8xf32> to vector<1x8xf32>
    %183 = vector.extract_strided_slice %181 {offsets = [1, 0], sizes = [1, 8], strides = [1, 1]} : vector<8x8xf32> to vector<1x8xf32>
    %184 = vector.extract_strided_slice %181 {offsets = [2, 0], sizes = [1, 8], strides = [1, 1]} : vector<8x8xf32> to vector<1x8xf32>
    %185 = vector.extract_strided_slice %181 {offsets = [3, 0], sizes = [1, 8], strides = [1, 1]} : vector<8x8xf32> to vector<1x8xf32>
    %186 = tpu.concatenate %182, %183, %184, %185 in 1 : vector<1x8xf32>, vector<1x8xf32>, vector<1x8xf32>, vector<1x8xf32> -> vector<1x32xf32>
    %187 = vector.extract_strided_slice %181 {offsets = [4, 0], sizes = [1, 8], strides = [1, 1]} : vector<8x8xf32> to vector<1x8xf32>
    %188 = vector.extract_strided_slice %181 {offsets = [5, 0], sizes = [1, 8], strides = [1, 1]} : vector<8x8xf32> to vector<1x8xf32>
    %189 = vector.extract_strided_slice %181 {offsets = [6, 0], sizes = [1, 8], strides = [1, 1]} : vector<8x8xf32> to vector<1x8xf32>
    %190 = vector.extract_strided_slice %181 {offsets = [7, 0], sizes = [1, 8], strides = [1, 1]} : vector<8x8xf32> to vector<1x8xf32>
    %191 = tpu.concatenate %187, %188, %189, %190 in 1 : vector<1x8xf32>, vector<1x8xf32>, vector<1x8xf32>, vector<1x8xf32> -> vector<1x32xf32>
    %192 = vector.extract_strided_slice %115 {offsets = [0, 24], sizes = [8, 8], strides = [1, 1]} : vector<8x32xf32> to vector<8x8xf32>
    %193 = vector.extract_strided_slice %116 {offsets = [0, 24], sizes = [8, 8], strides = [1, 1]} : vector<8x32xf32> to vector<8x8xf32>
    %194 = tpu.transpose %193, [1, 0] : vector<8x8xf32> -> vector<8x8xf32>
    %cst_39 = arith.constant dense<0.000000e+00> : vector<8x8xf32>
    %195 = tpu.matmul %192, %194, %cst_39 {dimension_numbers = #tpu.dot_dimension_numbers<[1], [0], [0], [1], [0, 0, 1, 1], [], []>} : vector<8x8xf32>, vector<8x8xf32>, vector<8x8xf32> -> vector<8x8xf32>
    %cst_40 = arith.constant dense<0xFF800000> : vector<8xf32>
    %196 = vector.multi_reduction <maximumf>, %195, %cst_40 [1] : vector<8x8xf32> to vector<8xf32>
    %197 = vector.shape_cast %196 : vector<8xf32> to vector<8x1xf32>
    %198 = vector.broadcast %197 : vector<8x1xf32> to vector<8x8xf32>
    %199 = arith.subf %195, %198 : vector<8x8xf32>
    %200 = math.exp %199 : vector<8x8xf32>
    %cst_41 = arith.constant dense<0.000000e+00> : vector<8xf32>
    %201 = vector.multi_reduction <add>, %200, %cst_41 [1] : vector<8x8xf32> to vector<8xf32>
    %202 = vector.shape_cast %201 : vector<8xf32> to vector<8x1xf32>
    %203 = tpu.reciprocal %202 {approx = true} : vector<8x1xf32> -> vector<8x1xf32>
    %204 = vector.broadcast %203 : vector<8x1xf32> to vector<8x8xf32>
    %205 = arith.mulf %200, %204 : vector<8x8xf32>
    %cst_42 = arith.constant dense<0.000000e+00> : vector<8x8xf32>
    %206 = tpu.matmul %205, %193, %cst_42 {dimension_numbers = #tpu.dot_dimension_numbers<[1], [0], [0], [1], [0, 0, 1, 1], [], []>} : vector<8x8xf32>, vector<8x8xf32>, vector<8x8xf32> -> vector<8x8xf32>
    %207 = vector.extract_strided_slice %206 {offsets = [0, 0], sizes = [1, 8], strides = [1, 1]} : vector<8x8xf32> to vector<1x8xf32>
    %208 = vector.extract_strided_slice %206 {offsets = [1, 0], sizes = [1, 8], strides = [1, 1]} : vector<8x8xf32> to vector<1x8xf32>
    %209 = vector.extract_strided_slice %206 {offsets = [2, 0], sizes = [1, 8], strides = [1, 1]} : vector<8x8xf32> to vector<1x8xf32>
    %210 = vector.extract_strided_slice %206 {offsets = [3, 0], sizes = [1, 8], strides = [1, 1]} : vector<8x8xf32> to vector<1x8xf32>
    %211 = tpu.concatenate %207, %208, %209, %210 in 1 : vector<1x8xf32>, vector<1x8xf32>, vector<1x8xf32>, vector<1x8xf32> -> vector<1x32xf32>
    %212 = vector.extract_strided_slice %206 {offsets = [4, 0], sizes = [1, 8], strides = [1, 1]} : vector<8x8xf32> to vector<1x8xf32>
    %213 = vector.extract_strided_slice %206 {offsets = [5, 0], sizes = [1, 8], strides = [1, 1]} : vector<8x8xf32> to vector<1x8xf32>
    %214 = vector.extract_strided_slice %206 {offsets = [6, 0], sizes = [1, 8], strides = [1, 1]} : vector<8x8xf32> to vector<1x8xf32>
    %215 = vector.extract_strided_slice %206 {offsets = [7, 0], sizes = [1, 8], strides = [1, 1]} : vector<8x8xf32> to vector<1x8xf32>
    %216 = tpu.concatenate %212, %213, %214, %215 in 1 : vector<1x8xf32>, vector<1x8xf32>, vector<1x8xf32>, vector<1x8xf32> -> vector<1x32xf32>
    %217 = tpu.concatenate %34, %39, %59, %64, %84, %89, %109, %114, %136, %141, %161, %166, %186, %191, %211, %216 in 0 : vector<1x32xf32>, vector<1x32xf32>, vector<1x32xf32>, vector<1x32xf32>, vector<1x32xf32>, vector<1x32xf32>, vector<1x32xf32>, vector<1x32xf32>, vector<1x32xf32>, vector<1x32xf32>, vector<1x32xf32>, vector<1x32xf32>, vector<1x32xf32>, vector<1x32xf32>, vector<1x32xf32>, vector<1x32xf32> -> vector<16x32xf32>
    %c0_43 = arith.constant 0 : index
    %c0_44 = arith.constant 0 : index
    %218 = vector.load %arg5[%c0_43, %c0_44] : memref<32x32xf32, #tpu.memory_space<vmem>>, vector<32x32xf32>
    %cst_45 = arith.constant dense<0.000000e+00> : vector<16x32xf32>
    %219 = tpu.matmul %217, %218, %cst_45 {dimension_numbers = #tpu.dot_dimension_numbers<[1], [0], [0], [1], [0, 0, 1, 1], [], []>} : vector<16x32xf32>, vector<32x32xf32>, vector<16x32xf32> -> vector<16x32xf32>
    %c0_46 = arith.constant 0 : index
    %c0_47 = arith.constant 0 : index
    %220 = vector.load %arg6[%c0_46, %c0_47] : memref<1x32xf32, #tpu.memory_space<vmem>>, vector<1x32xf32>
    %221 = vector.broadcast %220 : vector<1x32xf32> to vector<16x32xf32>
    %222 = arith.addf %219, %221 : vector<16x32xf32>
    %c0_48 = arith.constant 0 : index
    %c0_49 = arith.constant 0 : index
    %223 = vector.load %arg7[%c0_48, %c0_49] : memref<16x32xf32, #tpu.memory_space<vmem>>, vector<16x32xf32>
    tpu.vector_store %arg7[%c0_48, %c0_49], %222 {strides = array<i32>} : memref<16x32xf32, #tpu.memory_space<vmem>>, vector<16x32xf32>,
    return
  }
}

</mosaic_0001>

<bundles_post_ra>
// kernel: tpu_custom_call.1
= control target key start
LH: loop header
LB: loop body
LE: loop exit
PB: predicated region body
PF: predicated region fallthrough
CT: control target
= control target key end

     0   :  { %12 = vsyncpa [#allocation3], 0  ;;  %s1382_s0 = inlined_call_operand.hbm [shape: f32[16,32], index: 0, kind: input, shape index: {}]   ;;  %s1383_s1 = inlined_call_operand.hbm [shape: f32[32,32], index: 1, kind: input, shape index: {}]   ;;  %s1384_s2 = inlined_call_operand.vmem [shape: f32[1,32], index: 2, kind: input, shape index: {}]   ;;  %s1385_s3 = inlined_call_operand.hbm [shape: f32[32,32], index: 3, kind: input, shape index: {}]   ;;  %s1386_s4 = inlined_call_operand.vmem [shape: f32[1,32], index: 4, kind: input, shape index: {}]   ;;  %s1387_s5 = inlined_call_operand.hbm [shape: f32[32,32], index: 5, kind: input, shape index: {}]   ;;  %s1388_s6 = inlined_call_operand.vmem [shape: f32[1,32], index: 6, kind: input, shape index: {}]   ;;  %s1389_s7 = inlined_call_operand.hbm [shape: f32[16,32], index: 7, kind: output, shape index: {}]  }
   0x1   :  { %13 = vsyncpa [#allocation6], 0 }
   0x2   :  { %14 = vsyncpa [#allocation9], 0 }
   0x3   :  { %15 = vsyncpa [#allocation4], 0  ;;  %s33_s26 = sshll.u32 %s1383_s1, 4  ;;  %s1114_s27 = smov [#allocation5]   ;;  %s34_s26 = int_to_ptr.hbm [resolvable:$true] %s33_s26 }
   0x4   :  { %s35_s28 = sshll.u32 %s1114_s27, 4  ;;  %s20_s8 = sshll.u32 %s1382_s0, 4  ;;  %s36_s28 = int_to_ptr.vmem [resolvable:$true] %s35_s28  ;;  %s21_s8 = int_to_ptr.hbm [resolvable:$true] %s20_s8 }
   0x5   :  { %s1115_s9 = smov 128   ;;  %s1116_s10 = smov 8  }
   0x6   :  { %41 = dma.hbm_to_vmem [thread:$0]  %s34_s26, 512, %s36_s28, [#allocation6], %s1115_s9, %s1115_s9, %s1116_s10  }
   0x7   :  { %s1117_s11 = smov [#allocation2]   ;;  %s48_s1 = sshll.u32 %s1385_s3, 4  ;;  %s49_s1 = int_to_ptr.hbm [resolvable:$true] %s48_s1 }
   0x8   :  { %s22_s12 = sshll.u32 %s1117_s11, 4  ;;  %s63_s16 = sshll.u32 %s1387_s5, 4  ;;  %s23_s12 = int_to_ptr.vmem [resolvable:$true] %s22_s12  ;;  %s64_s16 = int_to_ptr.hbm [resolvable:$true] %s63_s16 }
   0x9   :  { %28 = dma.hbm_to_vmem [thread:$0]  %s21_s8, 256, %s23_s12, [#allocation3], %s1115_s9, %s1115_s9, %s1116_s10  }
   0xa   :  { %s1118_s17 = smov [#allocation7]   ;;  %s1119_s19 = smov [#allocation8]  }
   0xb   :  { %s50_s18 = sshll.u32 %s1118_s17, 4  ;;  %s65_s3 = sshll.u32 %s1119_s19, 4  ;;  %s51_s18 = int_to_ptr.vmem [resolvable:$true] %s50_s18  ;;  %s66_s3 = int_to_ptr.vmem [resolvable:$true] %s65_s3 }
   0xc   :  { %56 = dma.hbm_to_vmem [thread:$0]  %s49_s1, 512, %s51_s18, [#allocation6], %s1115_s9, %s1115_s9, %s1116_s10  }
   0xd   :  { %71 = dma.hbm_to_vmem [thread:$0]  %s64_s16, 512, %s66_s3, [#allocation9], %s1115_s9, %s1115_s9, %s1116_s10  }
   0xe   :  { %1106 = dma.done.wait [#allocation3], 256  }
   0xf   :  { %1107 = vsyncadd [#allocation3], 4294967040 }
  0x10   :  { %1108 = dma.done.wait [#allocation6], 1024  }
  0x11   :  { %1109 = vsyncadd [#allocation6], 4294966272 }
  0x12   :  { %1110 = dma.done.wait [#allocation9], 512  }
  0x13   :  { %1111 = vsyncadd [#allocation9], 4294966784  ;;  %v133_v0 = vld [vmem:[#allocation7 + $0x18] sm:$0xff]  ;;  %v132_v2 = vld [vmem:[#allocation7 + $0x10] sm:$0xff]  ;;  %vm100_vm0 = vcmask 261120   ;;  %vm163_vm1 = vcmask 64512  }
  0x14   :  { %v95_v1 = vld [vmem:[#allocation5 + $0x18] sm:$0xff]  ;;  %150 = vmatpush.msra.mxu1 %v133_v0  ;;  %v94_v3 = vld [vmem:[#allocation5 + $0x10] sm:$0xff]  ;;  %v131_v4 = vld [vmem:[#allocation7 + $0x8] sm:$0xff]  ;;  %s1120_s23 = smov 104   ;;  %s1121_s24 = smov 112   ;;  %vm238_vm2 = vcmask 130048  }
  0x15   :  { %119 = vmatpush.msra.mxu0 %v95_v1  ;;  %v93_v5 = vld [vmem:[#allocation5 + $0x8] sm:$0xff]  ;;  %v130_v6 = vld [vmem:[#allocation7] sm:$0xff]  ;;  %v90_v8 = vld [vmem:[#allocation2] sm:$0xff]  ;;  %s1122_s25 = smov 120   ;;  %vm240_vm3 = vcmask 195584   ;;  %vm828_vm4 = vcmask 1040384  }
  0x16   :  { %151 = vmatpush.msra.mxu1 %v132_v2  ;;  %v92_v7 = vld [vmem:[#allocation5] sm:$0xff]  ;;  %v91_v9 = vld [vmem:[#allocation2 + $0x8] sm:$0xff]  ;;  %v951_v10 = vld [vmem:[%s1386_s4] ss:$0 sm:$0xff]  ;;  %s1124_s4 = smov 24   ;;  %vm830_vm5 = vcmask 1041408  }
  0x17   :  { %120 = vmatpush.msra.mxu0 %v94_v3  ;;  %v952_v11 = vld [vmem:[%s1384_s2] ss:$0 sm:$0xff]  ;;  %s1123_s2 = smov 16   ;;  %vm832_vm6 = vcmask 1042432   ;;  %vm834_vm7 = vcmask 1043456   ;;  %vm836_vm8 = vcmask 1044480  }
  0x18   :  { %152 = vmatpush.msra.mxu1 %v131_v4  ;;  %vm838_vm9 = vcmask 1045504   ;;  %vm840_vm10 = vcmask 1046528   ;;  %s1125_s28 = smov [#allocation10]   ;;  %s894_s11 = sshll.u32 %s1389_s7, 4  ;;  %s895_s11 = int_to_ptr.hbm [resolvable:$true] %s894_s11 }
  0x19   :  { %121 = vmatpush.msra.mxu0 %v93_v5  ;;  %s892_s29 = sshll.u32 %s1125_s28, 4  ;;  %s893_s29 = int_to_ptr.vmem [resolvable:$true] %s892_s29 }
  0x1a   :  { %153 = vmatpush.msra.mxu1 %v130_v6 }
  0x1b   :  { %122 = vmatpush.msra.mxu0 %v92_v7  ;;  %911 = vmatmul.msk.f32.vlgmr.msra.gmra.mxu1 %vm100_vm0, %v90_v8 }
  0x1c   :  { %909 = vmatmul.msk.f32.vlgmr.msra.gmra.mxu0 %vm100_vm0, %v90_v8 }
  0x23   :  { %912 = vmatmul.msk.f32.gmra.mxu1 %vm100_vm0, %v91_v9 }
  0x24   :  { %910 = vmatmul.msk.f32.gmra.mxu0 %vm100_vm0, %v91_v9 }
  0x98   :  { %v155_v12 = vpop.f32.mrf.mxu1 }
  0x99   :  { %v124_v13 = vpop.f32.mrf.mxu0  ;;  %v156_v14 = vadd.f32 %v951_v10, %v155_v12 }
  0x9a   :  { %v125_v15 = vadd.f32 %v952_v11, %v124_v13 }
  0x9b   :  { %402 = vrot.lane.b32.xlu2 %v156_v14, %s1120_s23  ;;  %323 = vrot.lane.b32.xlu1 %v156_v14, %s1121_s24 }
  0x9c   :  { %v161_v16 = vmul.f32 0.35355338, %v125_v15  ;;  %244 = vrot.lane.b32.xlu0 %v156_v14, %s1122_s25  ;;  %913 = vmatpush.xpose.msk.msra.mxu2 %vm163_vm1, %v156_v14 }
  0x9f   :  { %914 = vmatmul.msk.f32.vlgmr.msra.gmra.mxu2 %vm163_vm1, %v161_v16 }
  0xa0   :  { %219 = vmatpush.msrb.mxu2 %v156_v14  ;;  %v158_v18 = vpop.f32.mrf.mxu1 }
  0xa1   :  { %v127_v17 = vpop.f32.mrf.mxu0  ;;  %v1202_v19 = vadd.f32 %v951_v10, %v158_v18 }
  0xa2   :  { %v128_v20 = vadd.f32 %v952_v11, %v127_v17 }
  0xa3   :  { %321 = vrot.lane.b32.xlu1 %v161_v16, %s1121_s24  ;;  %636 = vrot.lane.b32.xlu2 %v1202_v19, %s1121_s24 }
  0xa4   :  { %242 = vrot.lane.b32.xlu0 %v161_v16, %s1122_s25  ;;  %v162_v21 = vmul.f32 0.35355338, %v128_v20 }
  0xab   :  { %634 = vrot.lane.b32.xlu1 %v162_v21, %s1121_s24  ;;  %557 = vrot.lane.b32.xlu2 %v1202_v19, %s1122_s25 }
  0xac   :  { %400 = vrot.lane.b32.xlu0 %v161_v16, %s1120_s23 }
  0xb3   :  { %715 = vrot.lane.b32.xlu1 %v1202_v19, %s1120_s23  ;;  %713 = vrot.lane.b32.xlu2 %v162_v21, %s1120_s23 }
  0xb4   :  { %555 = vrot.lane.b32.xlu0 %v162_v21, %s1122_s25 }
  0xf5   :  { %v403_v22 = vpop.permute.xlu2 %402 }
  0xf6   :  { %922 = vmatpush.xpose.msk.msrb.mxu0 %vm163_vm1, %v403_v22  ;;  %458 = vmatpush.msrb.mxu1 %v403_v22 }
  0xfd   :  { %v1208_v23 = vpop.permute.xlu2 %636 }
 0x105   :  { %v558_v24 = vpop.permute.xlu2 %557 }
 0x106   :  { %928 = vmatpush.xpose.msk.msra.mxu0 %vm163_vm1, %v558_v24  ;;  %613 = vmatpush.msra.mxu1 %v558_v24 }
 0x10d   :  { %v1211_v25 = vpop.permute.xlu1 %323  ;;  %v714_v35 = vpop.permute.xlu2 %713 }
 0x10e   :  { %v245_v26 = vpop.permute.xlu0 %244 }
 0x10f   :  { %916 = vmatpush.xpose.msk.msra.mxu3 %vm163_vm1, %v245_v26  ;;  %300 = vmatpush.msra.mxu2 %v245_v26 }
 0x113   :  { %919 = vmatpush.xpose.msk.msrb.mxu3 %vm163_vm1, %v1211_v25 }
 0x115   :  { %v322_v27 = vpop.permute.xlu1 %321 }
 0x116   :  { %v243_v28 = vpop.permute.xlu0 %242 }
 0x117   :  { %917 = vmatmul.msk.f32.vlgmr.msra.gmra.mxu3 %vm163_vm1, %v243_v28 }
 0x118   :  { %925 = vmatpush.xpose.msk.msra.mxu3 %vm163_vm1, %v1202_v19 }
 0x11d   :  { %v635_v29 = vpop.permute.xlu1 %634 }
 0x11e   :  { %v401_v30 = vpop.permute.xlu0 %400 }
 0x11f   :  { %920 = vmatmul.msk.f32.vlgmr.msrb.gmra.mxu3 %vm163_vm1, %v322_v27  ;;  %923 = vmatmul.msk.f32.vlgmr.msrb.gmra.mxu0 %vm163_vm1, %v401_v30 }
 0x120   :  { %931 = vmatpush.xpose.msk.msrb.mxu3 %vm163_vm1, %v1208_v23 }
 0x122   :  { %v187_v31 = vpop.f32.mrf.mxu2 }
 0x123   :  { %v190_v32 = vsel %vm163_vm1, %v187_v31, -inf }
 0x124   :  { %191 = vmax.xlane.f32.xlu0 %v190_v32 }
 0x125   :  { %v1224_v33 = vpop.permute.xlu1 %715 }
 0x126   :  { %v556_v34 = vpop.permute.xlu0 %555  ;;  %934 = vmatpush.xpose.msk.msrb.mxu0 %vm163_vm1, %v1224_v33 }
 0x127   :  { %926 = vmatmul.msk.f32.vlgmr.msra.gmra.mxu3 %vm163_vm1, %v162_v21  ;;  %929 = vmatmul.msk.f32.vlgmr.msra.gmra.mxu0 %vm163_vm1, %v556_v34 }
 0x12f   :  { %932 = vmatmul.msk.f32.vlgmr.msrb.gmra.mxu3 %vm163_vm1, %v635_v29  ;;  %935 = vmatmul.msk.f32.vlgmr.msrb.gmra.mxu0 %vm163_vm1, %v714_v35 }
 0x197   :  { %v192_v36 = vpop.xlane.xlu0 %191 }
 0x198   :  { %v193_v39 = vsub.f32 %v187_v31, %v192_v36 }
 0x19a   :  { %v267_v37 = vpop.f32.mrf.mxu3  ;;  %v194_v41 = vmul.f32 1.442695, %v193_v39 }
 0x19b   :  { %v270_v38 = vsel %vm163_vm1, %v267_v37, -inf }
 0x19c   :  { %271 = vmax.xlane.f32.xlu1 %v270_v38  ;;  %v425_v40 = vpop.f32.mrf.mxu0  ;;  %954 = vpow2.f32 %v194_v41 }
 0x19d   :  { %v428_v48 = vsel %vm163_vm1, %v425_v40, -inf }
 0x1a2   :  { %v346_v42 = vpop.f32.mrf.mxu3  ;;  %v955_v46 = vpop.eup %954 }
 0x1a3   :  { %v349_v43 = vsel %vm163_vm1, %v346_v42, -inf  ;;  %v196_v50 = vsel %vm163_vm1, %v955_v46, 0.0 }
 0x1a4   :  { %350 = vmax.xlane.f32.xlu2 %v349_v43  ;;  %v580_v44 = vpop.f32.mrf.mxu0 }
 0x1a5   :  { %v583_v45 = vsel %vm163_vm1, %v580_v44, -inf }
 0x1a6   :  { %584 = vmax.xlane.f32.xlu1 %v583_v45 }
 0x1aa   :  { %v502_v47 = vpop.f32.mrf.mxu3 }
 0x1ab   :  { %v505_v49 = vsel %vm163_vm1, %v502_v47, -inf }
 0x1ac   :  { %429 = vmax.xlane.f32.xlu2 %v428_v48  ;;  %506 = vmax.xlane.f32.xlu0 %v505_v49  ;;  %v738_v51 = vpop.f32.mrf.mxu0 }
 0x1ad   :  { %v741_v54 = vsel %vm163_vm1, %v738_v51, -inf }
 0x1ae   :  { %197 = vadd.xlane.f32.xlu1 %v196_v50 }
 0x1b2   :  { %v659_v52 = vpop.f32.mrf.mxu3 }
 0x1b3   :  { %v662_v53 = vsel %vm163_vm1, %v659_v52, -inf }
 0x1b4   :  { %663 = vmax.xlane.f32.xlu2 %v662_v53  ;;  %742 = vmax.xlane.f32.xlu0 %v741_v54 }
 0x20f   :  { %v272_v55 = vpop.xlane.xlu1 %271 }
 0x210   :  { %v273_v56 = vsub.f32 %v267_v37, %v272_v55 }
 0x212   :  { %v274_v57 = vmul.f32 1.442695, %v273_v56 }
 0x214   :  { %956 = vpow2.f32 %v274_v57 }
 0x217   :  { %v351_v58 = vpop.xlane.xlu2 %350 }
 0x218   :  { %v352_v59 = vsub.f32 %v346_v42, %v351_v58 }
 0x219   :  { %v585_v60 = vpop.xlane.xlu1 %584 }
 0x21a   :  { %v957_v61 = vpop.eup %956  ;;  %v353_v62 = vmul.f32 1.442695, %v352_v59  ;;  %v586_v63 = vsub.f32 %v580_v44, %v585_v60 }
 0x21b   :  { %v276_v0 = vsel %vm163_vm1, %v957_v61, 0.0 }
 0x21c   :  { %958 = vpow2.f32 %v353_v62  ;;  %277 = vadd.xlane.f32.xlu2 %v276_v0  ;;  %v587_v1 = vmul.f32 1.442695, %v586_v63 }
 0x21e   :  { %960 = vpow2.f32 %v587_v1 }
 0x21f   :  { %v430_v2 = vpop.xlane.xlu2 %429  ;;  %v507_v3 = vpop.xlane.xlu0 %506 }
 0x220   :  { %v431_v4 = vsub.f32 %v425_v40, %v430_v2  ;;  %v508_v5 = vsub.f32 %v502_v47, %v507_v3 }
 0x221   :  { %v198_v6 = vpop.xlane.xlu1 %197 }
 0x222   :  { %v959_v7 = vpop.eup %958  ;;  %v432_v8 = vmul.f32 1.442695, %v431_v4  ;;  %v509_v9 = vmul.f32 1.442695, %v508_v5  ;;  %962 = vrcp.f32 %v198_v6 }
 0x223   :  { %v355_v10 = vsel %vm163_vm1, %v959_v7, 0.0 }
 0x224   :  { %964 = vpow2.f32 %v432_v8  ;;  %356 = vadd.xlane.f32.xlu0 %v355_v10  ;;  %v961_v11 = vpop.eup %960 }
 0x225   :  { %966 = vpow2.f32 %v509_v9  ;;  %v589_v24 = vsel %vm163_vm1, %v961_v11, 0.0 }
 0x227   :  { %v664_v12 = vpop.xlane.xlu2 %663  ;;  %v743_v13 = vpop.xlane.xlu0 %742 }
 0x228   :  { %v963_v14 = vpop.eup %962  ;;  %v665_v15 = vsub.f32 %v659_v52, %v664_v12  ;;  %v744_v16 = vsub.f32 %v738_v51, %v743_v13 }
 0x229   :  { %v200_v17 = vmul.f32 %v963_v14, %v955_v46 }
 0x22a   :  { %v965_v18 = vpop.eup %964  ;;  %v666_v20 = vmul.f32 1.442695, %v665_v15  ;;  %v745_v21 = vmul.f32 1.442695, %v744_v16 }
 0x22b   :  { %v967_v22 = vpop.eup %966  ;;  %915 = vmatmul.msk.f32.vlgmr.msrb.gmra.mxu2 %vm163_vm1, %v200_v17  ;;  %v434_v26 = vsel %vm163_vm1, %v965_v18, 0.0 }
 0x22c   :  { %968 = vpow2.f32 %v666_v20  ;;  %379 = vmatpush.msrb.mxu2 %v1211_v25  ;;  %590 = vadd.xlane.f32.xlu0 %v589_v24  ;;  %v511_v27 = vsel %vm163_vm1, %v967_v22, 0.0 }
 0x22d   :  { %970 = vpow2.f32 %v745_v21  ;;  %435 = vadd.xlane.f32.xlu1 %v434_v26  ;;  %512 = vadd.xlane.f32.xlu2 %v511_v27 }
 0x232   :  { %v969_v28 = vpop.eup %968 }
 0x233   :  { %v971_v29 = vpop.eup %970  ;;  %v668_v30 = vsel %vm163_vm1, %v969_v28, 0.0 }
 0x234   :  { %v747_v31 = vsel %vm163_vm1, %v971_v29, 0.0 }
 0x235   :  { %669 = vadd.xlane.f32.xlu1 %v668_v30  ;;  %748 = vadd.xlane.f32.xlu2 %v747_v31  ;;  %v850_v31 = vld [vmem:[#allocation8 + $0x8] sm:$0xff] }
 0x28f   :  { %v278_v32 = vpop.xlane.xlu2 %277 }
 0x290   :  { %972 = vrcp.f32 %v278_v32  ;;  %v849_v32 = vld [vmem:[#allocation8] sm:$0xff] }
 0x296   :  { %v973_v34 = vpop.eup %972 }
 0x297   :  { %v280_v35 = vmul.f32 %v973_v34, %v957_v61  ;;  %v357_v36 = vpop.xlane.xlu0 %356 }
 0x298   :  { %974 = vrcp.f32 %v357_v36 }
 0x299   :  { %918 = vmatmul.msk.f32.vlgmr.msra.gmra.mxu2 %vm163_vm1, %v280_v35 }
 0x29a   :  { %534 = vmatpush.msra.mxu2 %v1202_v19 }
 0x29e   :  { %v975_v25 = vpop.eup %974 }
 0x29f   :  { %v359_v37 = vmul.f32 %v975_v25, %v959_v7  ;;  %v591_v40 = vpop.xlane.xlu0 %590 }
 0x2a0   :  { %v436_v38 = vpop.xlane.xlu1 %435  ;;  %v513_v39 = vpop.xlane.xlu2 %512 }
 0x2a1   :  { %976 = vrcp.f32 %v436_v38  ;;  %921 = vmatmul.msk.f32.vlgmr.msrb.gmra.mxu2 %vm163_vm1, %v359_v37 }
 0x2a2   :  { %978 = vrcp.f32 %v513_v39  ;;  %692 = vmatpush.msrb.mxu2 %v1208_v23 }
 0x2a3   :  { %980 = vrcp.f32 %v591_v40 }
 0x2a7   :  { %v977_v41 = vpop.eup %976 }
 0x2a8   :  { %v979_v42 = vpop.eup %978  ;;  %v670_v43 = vpop.xlane.xlu1 %669  ;;  %v438_v44 = vmul.f32 %v977_v41, %v965_v18 }
 0x2a9   :  { %v515_v45 = vmul.f32 %v979_v42, %v967_v22  ;;  %982 = vrcp.f32 %v670_v43  ;;  %v749_v19 = vpop.xlane.xlu2 %748  ;;  %v981_v46 = vpop.eup %980 }
 0x2aa   :  { %924 = vmatmul.msk.f32.vlgmr.msrb.gmra.mxu1 %vm163_vm1, %v438_v44  ;;  %984 = vrcp.f32 %v749_v19  ;;  %v593_v50 = vmul.f32 %v981_v46, %v961_v11 }
 0x2ab   :  { %927 = vmatmul.msk.f32.vlgmr.msra.gmra.mxu2 %vm163_vm1, %v515_v45  ;;  %771 = vmatpush.msrb.mxu1 %v1224_v33 }
 0x2ae   :  { %v1256_v47 = vpop.f32.mrf.mxu2 }
 0x2af   :  { %v983_v48 = vpop.eup %982  ;;  %v229_v23 = vrot.slane %v1256_v47, 2  ;;  %v225_v49 = vrot.slane %v1256_v47, 1  ;;  %v233_v52 = vrot.slane %v1256_v47, 3 }
 0x2b0   :  { %v672_v51 = vmul.f32 %v983_v48, %v969_v28  ;;  %v985_v33 = vpop.eup %984  ;;  %v852_v28 = vld [vmem:[#allocation8 + $0x18] sm:$0xff] }
 0x2b1   :  { %230 = vrot.lane.b32.xlu1 %v229_v23, %s1123_s2  ;;  %226 = vrot.lane.b32.xlu0 %v225_v49, %s1116_s10  ;;  %v751_v53 = vmul.f32 %v985_v33, %v971_v29  ;;  %v851_v29 = vld [vmem:[#allocation8 + $0x10] sm:$0xff] }
 0x2b2   :  { %930 = vmatmul.msk.f32.vlgmr.msra.gmra.mxu1 %vm163_vm1, %v593_v50  ;;  %875 = vmatpush.msra.mxu3 %v852_v28 }
 0x2b3   :  { %933 = vmatmul.msk.f32.vlgmr.msrb.gmra.mxu2 %vm163_vm1, %v672_v51 }
 0x2b4   :  { %876 = vmatpush.msra.mxu3 %v851_v29 }
 0x2b6   :  { %877 = vmatpush.msra.mxu3 %v850_v31 }
 0x2b8   :  { %878 = vmatpush.msra.mxu3 %v849_v32 }
 0x2b9   :  { %234 = vrot.lane.b32.xlu0 %v233_v52, %s1124_s4 }
 0x2ba   :  { %936 = vmatmul.msk.f32.vlgmr.msrb.gmra.mxu1 %vm163_vm1, %v751_v53 }
 0x31c   :  { %v1272_v58 = vpop.f32.mrf.mxu2 }
 0x31d   :  { %v306_v62 = vrot.slane %v1272_v58, 1  ;;  %v310_v0 = vrot.slane %v1272_v58, 2  ;;  %v314_v5 = vrot.slane %v1272_v58, 3 }
 0x323   :  { %v227_v18 = vpop.permute.xlu0 %226  ;;  %v231_v21 = vpop.permute.xlu1 %230 }
 0x324   :  { %v1285_v63 = vpop.f32.mrf.mxu2  ;;  %v237_v38 = vsel %vm163_vm1, %v1256_v47, %v227_v18 }
 0x325   :  { %v385_v2 = vrot.slane %v1285_v63, 1  ;;  %v389_v4 = vrot.slane %v1285_v63, 2  ;;  %v393_v8 = vrot.slane %v1285_v63, 3  ;;  %v239_v39 = vsel %vm238_vm2, %v237_v38, %v231_v21 }
 0x327   :  { %v1267_v54 = vpop.f32.mrf.mxu1 }
 0x328   :  { %v472_v55 = vrot.slane %v1267_v54, 3  ;;  %v468_v56 = vrot.slane %v1267_v54, 2  ;;  %v464_v57 = vrot.slane %v1267_v54, 1 }
 0x32a   :  { %473 = vrot.lane.b32.xlu0 %v472_v55, %s1124_s4  ;;  %469 = vrot.lane.b32.xlu1 %v468_v56, %s1123_s2 }
 0x32b   :  { %465 = vrot.lane.b32.xlu2 %v464_v57, %s1116_s10  ;;  %v235_v22 = vpop.permute.xlu0 %234 }
 0x32c   :  { %v241_v41 = vsel %vm240_vm3, %v239_v39, %v235_v22 }
 0x32d   :  { %v793_v46 = vrot.slane %v241_v41, 3 }
 0x32e   :  { %v1293_v3 = vpop.f32.mrf.mxu2 }
 0x32f   :  { %v1277_v59 = vpop.f32.mrf.mxu1  ;;  %v540_v6 = vrot.slane %v1293_v3, 1  ;;  %v544_v7 = vrot.slane %v1293_v3, 2  ;;  %v548_v9 = vrot.slane %v1293_v3, 3  ;;  %v829_v49 = vsel %vm828_vm4, %v241_v41, %v793_v46 }
 0x330   :  { %v623_v60 = vrot.slane %v1277_v59, 2  ;;  %v619_v61 = vrot.slane %v1277_v59, 1  ;;  %v627_v1 = vrot.slane %v1277_v59, 3 }
 0x332   :  { %624 = vrot.lane.b32.xlu1 %v623_v60, %s1123_s2  ;;  %620 = vrot.lane.b32.xlu0 %v619_v61, %s1116_s10 }
 0x333   :  { %307 = vrot.lane.b32.xlu2 %v306_v62, %s1116_s10 }
 0x336   :  { %v1307_v10 = vpop.f32.mrf.mxu2 }
 0x337   :  { %v702_v11 = vrot.slane %v1307_v10, 2  ;;  %v706_v12 = vrot.slane %v1307_v10, 3  ;;  %v698_v13 = vrot.slane %v1307_v10, 1  ;;  %v1315_v14 = vpop.f32.mrf.mxu1 }
 0x338   :  { %v781_v15 = vrot.slane %v1315_v14, 2  ;;  %v785_v16 = vrot.slane %v1315_v14, 3  ;;  %v777_v17 = vrot.slane %v1315_v14, 1 }
 0x33a   :  { %311 = vrot.lane.b32.xlu1 %v310_v0, %s1123_s2  ;;  %628 = vrot.lane.b32.xlu0 %v627_v1, %s1124_s4 }
 0x33b   :  { %386 = vrot.lane.b32.xlu2 %v385_v2, %s1116_s10 }
 0x342   :  { %390 = vrot.lane.b32.xlu1 %v389_v4, %s1123_s2  ;;  %315 = vrot.lane.b32.xlu0 %v314_v5, %s1124_s4 }
 0x343   :  { %541 = vrot.lane.b32.xlu2 %v540_v6, %s1116_s10 }
 0x34a   :  { %545 = vrot.lane.b32.xlu1 %v544_v7, %s1123_s2  ;;  %394 = vrot.lane.b32.xlu0 %v393_v8, %s1124_s4 }
 0x34b   :  { %549 = vrot.lane.b32.xlu2 %v548_v9, %s1124_s4 }
 0x352   :  { %703 = vrot.lane.b32.xlu1 %v702_v11, %s1123_s2  ;;  %707 = vrot.lane.b32.xlu0 %v706_v12, %s1124_s4 }
 0x353   :  { %699 = vrot.lane.b32.xlu2 %v698_v13, %s1116_s10 }
 0x35a   :  { %782 = vrot.lane.b32.xlu1 %v781_v15, %s1123_s2  ;;  %786 = vrot.lane.b32.xlu0 %v785_v16, %s1124_s4 }
 0x35b   :  { %778 = vrot.lane.b32.xlu2 %v777_v17, %s1116_s10 }
 0x385   :  { %v466_v20 = vpop.permute.xlu2 %465 }
 0x386   :  { %v476_v47 = vsel %vm163_vm1, %v1267_v54, %v466_v20 }
 0x38d   :  { %v308_v24 = vpop.permute.xlu2 %307 }
 0x38e   :  { %v318_v40 = vsel %vm163_vm1, %v1272_v58, %v308_v24 }
 0x395   :  { %v387_v30 = vpop.permute.xlu2 %386 }
 0x396   :  { %v397_v50 = vsel %vm163_vm1, %v1285_v63, %v387_v30 }
 0x39c   :  { %v470_v26 = vpop.permute.xlu1 %469  ;;  %v474_v27 = vpop.permute.xlu0 %473 }
 0x39d   :  { %v542_v36 = vpop.permute.xlu2 %541  ;;  %v477_v23 = vsel %vm238_vm2, %v476_v47, %v470_v26 }
 0x39e   :  { %v552_v33 = vsel %vm163_vm1, %v1293_v3, %v542_v36  ;;  %v478_v54 = vsel %vm240_vm3, %v477_v23, %v474_v27 }
 0x39f   :  { %v806_v1 = vrot.slane %v478_v54, 2  ;;  %v808_v4 = vrot.slane %v478_v54, 5 }
 0x3a4   :  { %v625_v34 = vpop.permute.xlu1 %624  ;;  %v621_v35 = vpop.permute.xlu0 %620 }
 0x3a5   :  { %v550_v45 = vpop.permute.xlu2 %549  ;;  %v631_v2 = vsel %vm163_vm1, %v1277_v59, %v621_v35 }
 0x3a6   :  { %v632_v8 = vsel %vm238_vm2, %v631_v2, %v625_v34 }
 0x3ac   :  { %v312_v25 = vpop.permute.xlu1 %311  ;;  %v629_v37 = vpop.permute.xlu0 %628 }
 0x3ad   :  { %v319_v42 = vsel %vm238_vm2, %v318_v40, %v312_v25  ;;  %v700_v62 = vpop.permute.xlu2 %699  ;;  %v633_v12 = vsel %vm240_vm3, %v632_v8, %v629_v37 }
 0x3ae   :  { %v710_v11 = vsel %vm163_vm1, %v1307_v10, %v700_v62  ;;  %v814_v18 = vrot.slane %v633_v12, 6  ;;  %v816_v24 = vrot.slane %v633_v12, 1 }
 0x3b4   :  { %v391_v43 = vpop.permute.xlu1 %390  ;;  %v316_v44 = vpop.permute.xlu0 %315 }
 0x3b5   :  { %v320_v19 = vsel %vm240_vm3, %v319_v42, %v316_v44  ;;  %v398_v52 = vsel %vm238_vm2, %v397_v50, %v391_v43  ;;  %v779_v20 = vpop.permute.xlu2 %778 }
 0x3b6   :  { %v796_v48 = vrot.slane %v320_v19, 6  ;;  %v798_v51 = vrot.slane %v320_v19, 1  ;;  %v789_v10 = vsel %vm163_vm1, %v1315_v14, %v779_v20  ;;  %v953_v14 = vld [vmem:[%s1388_s6] ss:$0 sm:$0xff] }
 0x3b8   :  { %v831_v53 = vsel %vm830_vm5, %v829_v49, %v796_v48 }
 0x3b9   :  { %v833_v63 = vsel %vm832_vm6, %v831_v53, %v798_v51 }
 0x3bc   :  { %v546_v55 = vpop.permute.xlu1 %545  ;;  %v395_v56 = vpop.permute.xlu0 %394 }
 0x3bd   :  { %v553_v57 = vsel %vm238_vm2, %v552_v33, %v546_v55  ;;  %v399_v58 = vsel %vm240_vm3, %v398_v52, %v395_v56 }
 0x3be   :  { %v801_v60 = vrot.slane %v399_v58, 4  ;;  %v803_v61 = vrot.slane %v399_v58, 7  ;;  %v554_v0 = vsel %vm240_vm3, %v553_v57, %v550_v45 }
 0x3bf   :  { %v811_v6 = vrot.slane %v554_v0, 3 }
 0x3c0   :  { %v835_v3 = vsel %vm834_vm7, %v833_v63, %v801_v60 }
 0x3c1   :  { %v837_v5 = vsel %vm836_vm8, %v835_v3, %v803_v61  ;;  %v842_v16 = vsel %vm828_vm4, %v554_v0, %v811_v6 }
 0x3c2   :  { %v839_v7 = vsel %vm838_vm9, %v837_v5, %v806_v1  ;;  %v843_v21 = vsel %vm830_vm5, %v842_v16, %v814_v18 }
 0x3c3   :  { %v841_v9 = vsel %vm840_vm10, %v839_v7, %v808_v4  ;;  %v844_v26 = vsel %vm832_vm6, %v843_v21, %v816_v24 }
 0x3c4   :  { %v704_v13 = vpop.permute.xlu1 %703  ;;  %937 = vmatmul.msk.f32.vlgmr.msra.gmra.mxu3 %vm100_vm0, %v841_v9  ;;  %v708_v59 = vpop.permute.xlu0 %707 }
 0x3c5   :  { %v711_v15 = vsel %vm238_vm2, %v710_v11, %v704_v13 }
 0x3c6   :  { %v712_v17 = vsel %vm240_vm3, %v711_v15, %v708_v59 }
 0x3c7   :  { %v819_v22 = vrot.slane %v712_v17, 4  ;;  %v821_v27 = vrot.slane %v712_v17, 7 }
 0x3c9   :  { %v845_v30 = vsel %vm834_vm7, %v844_v26, %v819_v22 }
 0x3ca   :  { %v846_v36 = vsel %vm836_vm8, %v845_v30, %v821_v27 }
 0x3cc   :  { %v783_v28 = vpop.permute.xlu1 %782  ;;  %v787_v29 = vpop.permute.xlu0 %786 }
 0x3cd   :  { %v790_v31 = vsel %vm238_vm2, %v789_v10, %v783_v28 }
 0x3ce   :  { %v791_v32 = vsel %vm240_vm3, %v790_v31, %v787_v29 }
 0x3cf   :  { %v824_v34 = vrot.slane %v791_v32, 2  ;;  %v826_v35 = vrot.slane %v791_v32, 5 }
 0x3d1   :  { %v847_v25 = vsel %vm838_vm9, %v846_v36, %v824_v34 }
 0x3d2   :  { %v848_v37 = vsel %vm840_vm10, %v847_v25, %v826_v35 }
 0x3d3   :  { %938 = vmatmul.msk.f32.gmra.mxu3 %vm100_vm0, %v848_v37 }
 0x447   :  { %v880_v38 = vpop.f32.mrf.mxu3 }
 0x448   :  { %v881_v39 = vadd.f32 %v953_v14, %v880_v38 }
 0x44a   :  { %886 = vst.msk [vmem:[#allocation10] sm:$0xff] %vm100_vm0, %v881_v39 }
 0x456   :  { %v883_v40 = vpop.f32.mrf.mxu3 }
 0x457   :  { %v884_v41 = vadd.f32 %v953_v14, %v883_v40 }
 0x459   :  { %887 = vst.msk [vmem:[#allocation10 + $0x8] sm:$0xff] %vm100_vm0, %v884_v41 }
 0x45a   :  { %900 = dma.vmem_to_hbm [thread:$0]  %s893_s29, 256, %s895_s11, [#allocation4], %s1115_s9, %s1115_s9, %s1116_s10  }
 0x45b   :  { %1112 = dma.done.wait [#allocation4], 256  }
 0x45c   :  { %1113 = vsyncadd [#allocation4], 4294967040 }
 0x45d   :  { %905 = vsyncpa [#allocation3], 1 }
 0x45e   :  { %906 = vsyncpa [#allocation6], 1 }
 0x45f   :  { %907 = vsyncpa [#allocation9], 1 }
 0x460   :  { %908 = vsyncpa [#allocation4], 1 }

</bundles_post_ra>
